<compile_context>
chip_gen: v6e
topology: v6e:2x2x1
jax: 0.10.0
libtpu: 0.0.40
codegen_flags: <defaults>
</compile_context>

<pallas_src>
import functools

import jax
import jax.numpy as jnp
import numpy as np
from jax.experimental import pallas as pl
from jax.experimental.pallas import tpu as pltpu


# ----------------------------------------------------------------------------
# Shared epilogue: row-wise dots -> stable -log(sigmoid) -> weighted scalar sum
# ----------------------------------------------------------------------------
def _loss_from_rows(ctx_rows, tgt_rows, loss_ref, *, n_pos, n_neg, n_total):
    b_pad = ctx_rows.shape[0]
    dots = jnp.sum(ctx_rows * tgt_rows, axis=1, keepdims=True)           # (b_pad, 1)

    row = jax.lax.broadcasted_iota(jnp.int32, (b_pad, 1), 0)
    is_pos = row < n_pos
    is_valid = row < n_total

    # -log(sigmoid(s*x)) == softplus(-s*x); positives: softplus(-dot),
    # negatives: softplus(+dot).  Stable for large |dot|.
    x = jnp.where(is_valid, jnp.where(is_pos, -dots, dots), 0.0)
    softplus = jnp.maximum(x, 0.0) + jnp.log(1.0 + jnp.exp(-jnp.abs(x)))

    w = jnp.where(is_pos, 1.0 / n_pos, 1.0 / n_neg)
    w = jnp.where(is_valid, w, 0.0)
    loss_ref[0, 0] = jnp.sum(w * softplus)


# ----------------------------------------------------------------------------
# Fast path: whole tables resident in VMEM, in-VMEM row gather.
# ----------------------------------------------------------------------------
def _skipgram_vmem_kernel(ctx_idx_ref, tgt_idx_ref,     # SMEM: (b_pad,) int32
                          ctx_tbl_ref, tgt_tbl_ref,     # VMEM: (V, D) table dtype
                          loss_ref,                     # SMEM out: (1, 1) f32
                          ctx_buf, tgt_buf,             # VMEM scratch: (b_pad, D)
                          *, n_pos, n_neg, n_total, b_pad):
    # Unrolled in-VMEM gather of the needed rows (b_pad is a small static int).
    for i in range(b_pad):
        ci = ctx_idx_ref[i]
        ti = tgt_idx_ref[i]
        ctx_buf[pl.ds(i, 1), :] = ctx_tbl_ref[pl.ds(ci, 1), :]
        tgt_buf[pl.ds(i, 1), :] = tgt_tbl_ref[pl.ds(ti, 1), :]

    _loss_from_rows(ctx_buf[...].astype(jnp.float32),
                    tgt_buf[...].astype(jnp.float32),
                    loss_ref, n_pos=n_pos, n_neg=n_neg, n_total=n_total)


# ----------------------------------------------------------------------------
# Large-vocab path: tables in HBM, per-row DMA gather, ONE aggregated wait
# per table (all row copies signal the same scalar semaphore).
# ----------------------------------------------------------------------------
def _skipgram_hbm_kernel(ctx_idx_ref, tgt_idx_ref,      # SMEM: (b_pad,) int32
                         ctx_emb_hbm, tgt_emb_hbm,      # HBM (ANY): (V, D)
                         loss_ref,                      # SMEM out: (1, 1) f32
                         ctx_buf, tgt_buf,              # VMEM scratch: (b_pad, D)
                         ctx_sem, tgt_sem,              # scalar DMA semaphores
                         *, n_pos, n_neg, n_total, b_pad):
    # Issue all 2*b_pad row copies, fully unrolled so SMEM index loads and
    # DMA-descriptor pushes co-issue across iterations.
    for i in range(b_pad):
        ci = ctx_idx_ref[i]
        ti = tgt_idx_ref[i]
        pltpu.make_async_copy(ctx_emb_hbm.at[ci], ctx_buf.at[i], ctx_sem).start()
        pltpu.make_async_copy(tgt_emb_hbm.at[ti], tgt_buf.at[i], tgt_sem).start()

    # One aggregated wait per table: descriptor spans the whole (b_pad, D)
    # buffer, whose byte count equals the sum of the b_pad row copies.
    pltpu.make_async_copy(ctx_buf, ctx_buf, ctx_sem).wait()
    pltpu.make_async_copy(tgt_buf, tgt_buf, tgt_sem).wait()

    _loss_from_rows(ctx_buf[...].astype(jnp.float32),
                    tgt_buf[...].astype(jnp.float32),
                    loss_ref, n_pos=n_pos, n_neg=n_neg, n_total=n_total)


# ----------------------------------------------------------------------------
# Wrapper
# ----------------------------------------------------------------------------
def skipgram_loss(positive_context, positive_target,
                  negative_context, negative_target,
                  context_embeddings, target_embeddings,
                  *, force_path=None):
    """Forward pass of SkipGramModel: scalar loss (mean pos loss + mean neg loss)."""
    n_pos = int(positive_context.shape[0])
    n_neg = int(negative_context.shape[0])
    if n_pos == 0 or n_neg == 0:
        raise ValueError("skipgram_loss requires non-empty positive and negative batches")
    n_total = n_pos + n_neg
    b_pad = max(8, ((n_total + 7) // 8) * 8)        # round rows up to sublane tile

    V, D = context_embeddings.shape
    tbl_dtype = context_embeddings.dtype            # keep native dtype (no HBM convert pass)
    itemsize = jnp.dtype(tbl_dtype).itemsize

    # One combined index vector per table (pos then neg); padded rows use
    # index 0 (in bounds) and are masked out of the loss inside the kernel.
    ctx_idx = jnp.concatenate([positive_context.reshape(-1),
                               negative_context.reshape(-1)]).astype(jnp.int32)
    tgt_idx = jnp.concatenate([positive_target.reshape(-1),
                               negative_target.reshape(-1)]).astype(jnp.int32)
    if b_pad != n_total:
        ctx_idx = jnp.pad(ctx_idx, (0, b_pad - n_total))
        tgt_idx = jnp.pad(tgt_idx, (0, b_pad - n_total))

    table_bytes = 2 * V * D * itemsize              # both tables
    scratch_bytes = 2 * b_pad * D * itemsize
    # Whole-table-in-VMEM fast path: budget is conservative w.r.t. v7x's 64 MiB
    # per-TC VMEM (2x headroom for buffering + internal scratch).
    fits_vmem = (2 * table_bytes + scratch_bytes) <= (24 << 20)
    if force_path == "vmem":
        use_vmem = True
    elif force_path == "hbm":
        use_vmem = False
    else:
        use_vmem = fits_vmem

    smem = pltpu.MemorySpace.SMEM
    vmem = pltpu.MemorySpace.VMEM

    if use_vmem:
        kernel = functools.partial(_skipgram_vmem_kernel,
                                   n_pos=n_pos, n_neg=n_neg,
                                   n_total=n_total, b_pad=b_pad)
        # Explicit VMEM limit: v5e's scoped default is only 16 MiB.
        vmem_limit = int(min(max(2 * table_bytes + scratch_bytes + (4 << 20),
                                 16 << 20), 40 << 20))
        out = pl.pallas_call(
            kernel,
            out_shape=jax.ShapeDtypeStruct((1, 1), jnp.float32),
            in_specs=[
                pl.BlockSpec(memory_space=smem),    # context indices
                pl.BlockSpec(memory_space=smem),    # target indices
                pl.BlockSpec(memory_space=vmem),    # whole context table in VMEM
                pl.BlockSpec(memory_space=vmem),    # whole target table in VMEM
            ],
            out_specs=pl.BlockSpec(memory_space=smem),
            scratch_shapes=[
                pltpu.VMEM((b_pad, D), tbl_dtype),
                pltpu.VMEM((b_pad, D), tbl_dtype),
            ],
            compiler_params=pltpu.CompilerParams(vmem_limit_bytes=vmem_limit),
        )(ctx_idx, tgt_idx, context_embeddings, target_embeddings)
    else:
        kernel = functools.partial(_skipgram_hbm_kernel,
                                   n_pos=n_pos, n_neg=n_neg,
                                   n_total=n_total, b_pad=b_pad)
        out = pl.pallas_call(
            kernel,
            out_shape=jax.ShapeDtypeStruct((1, 1), jnp.float32),
            in_specs=[
                pl.BlockSpec(memory_space=smem),    # context indices
                pl.BlockSpec(memory_space=smem),    # target indices
                pl.BlockSpec(memory_space=pl.ANY),  # context table stays in HBM
                pl.BlockSpec(memory_space=pl.ANY),  # target table stays in HBM
            ],
            out_specs=pl.BlockSpec(memory_space=smem),
            scratch_shapes=[
                pltpu.VMEM((b_pad, D), tbl_dtype),
                pltpu.VMEM((b_pad, D), tbl_dtype),
                pltpu.SemaphoreType.DMA(()),        # one sem per table
                pltpu.SemaphoreType.DMA(()),
            ],
        )(ctx_idx, tgt_idx, context_embeddings, target_embeddings)

    return out[0, 0]


def skipgram_loss_ref(pos_ctx, pos_tgt, neg_ctx, neg_tgt, ctx_emb, tgt_emb):
    """Pure-JAX reference mirroring the PyTorch forward."""
    pce = ctx_emb[pos_ctx]
    pte = tgt_emb[pos_tgt]
    pd = jnp.sum(pte * pce, axis=1)
    pos_loss = -jnp.mean(jnp.log(jax.nn.sigmoid(pd)))
    nce = ctx_emb[neg_ctx]
    nte = tgt_emb[neg_tgt]
    nd = jnp.sum(nte * nce, axis=1)
    neg_loss = -jnp.mean(jnp.log(jax.nn.sigmoid(-nd)))
    return pos_loss + neg_loss


if __name__ == "__main__":
    vocab_size = 64
    embedding_dim = 128
    n_pos = 8
    n_neg = 16

    key = jax.random.PRNGKey(0)
    k_ctx, k_tgt, k_pc, k_pt, k_nc, k_nt = jax.random.split(key, 6)

    # Xavier-uniform init (matches torch.nn.init.xavier_uniform_ for [V, D]).
    bound = float(np.sqrt(6.0 / (vocab_size + embedding_dim)))
    context_embeddings = jax.random.uniform(
        k_ctx, (vocab_size, embedding_dim), jnp.float32, -bound, bound)
    target_embeddings = jax.random.uniform(
        k_tgt, (vocab_size, embedding_dim), jnp.float32, -bound, bound)

    positive_context = jax.random.randint(k_pc, (n_pos,), 0, vocab_size, jnp.int32)
    positive_target = jax.random.randint(k_pt, (n_pos,), 0, vocab_size, jnp.int32)
    negative_context = jax.random.randint(k_nc, (n_neg,), 0, vocab_size, jnp.int32)
    negative_target = jax.random.randint(k_nt, (n_neg,), 0, vocab_size, jnp.int32)

    # --- Small-vocab (default) path: whole tables in VMEM. -------------------
    loss = jax.block_until_ready(
        skipgram_loss(positive_context, positive_target,
                      negative_context, negative_target,
                      context_embeddings, target_embeddings))
    ref = skipgram_loss_ref(positive_context, positive_target,
                            negative_context, negative_target,
                            context_embeddings, target_embeddings)
    np.testing.assert_allclose(np.asarray(loss), np.asarray(ref),
                               rtol=1e-5, atol=1e-5)

    # --- Large-vocab path: HBM tables + per-row DMA gather, aggregated waits. -
    big_vocab = 2048
    kb = jax.random.split(jax.random.PRNGKey(1), 6)
    big_ctx_emb = jax.random.uniform(kb[0], (big_vocab, embedding_dim),
                                     jnp.float32, -bound, bound)
    big_tgt_emb = jax.random.uniform(kb[1], (big_vocab, embedding_dim),
                                     jnp.float32, -bound, bound)
    b_pc = jax.random.randint(kb[2], (n_pos,), 0, big_vocab, jnp.int32)
    b_pt = jax.random.randint(kb[3], (n_pos,), 0, big_vocab, jnp.int32)
    b_nc = jax.random.randint(kb[4], (n_neg,), 0, big_vocab, jnp.int32)
    b_nt = jax.random.randint(kb[5], (n_neg,), 0, big_vocab, jnp.int32)

    loss_hbm = jax.block_until_ready(
        skipgram_loss(b_pc, b_pt, b_nc, b_nt, big_ctx_emb, big_tgt_emb,
                      force_path="hbm"))
    ref_hbm = skipgram_loss_ref(b_pc, b_pt, b_nc, b_nt, big_ctx_emb, big_tgt_emb)
    np.testing.assert_allclose(np.asarray(loss_hbm), np.asarray(ref_hbm),
                               rtol=1e-5, atol=1e-5)

    print("KERNEL_OK")
</pallas_src>

<mosaic_0001>
module attributes {stable_mosaic.version = 11 : i64} {
  func.func @_skipgram_vmem_kernel(%arg0: memref<24xi32, #tpu.memory_space<smem>>, %arg1: memref<24xi32, #tpu.memory_space<smem>>, %arg2: memref<64x128xf32, #tpu.memory_space<vmem>>, %arg3: memref<64x128xf32, #tpu.memory_space<vmem>>, %arg4: memref<1x1xf32, #tpu.memory_space<smem>>, %arg5: memref<24x128xf32, #tpu.memory_space<vmem>>, %arg6: memref<24x128xf32, #tpu.memory_space<vmem>>) attributes {dimension_semantics = [], scalar_prefetch = 0 : i64, scratch_operands = 2 : i64, tpu.core_type = #tpu.core_type<tc>} {
    %c0 = arith.constant 0 : index
    %0 = memref.load %arg0[%c0] : memref<24xi32, #tpu.memory_space<smem>>
    %c0_0 = arith.constant 0 : index
    %1 = memref.load %arg1[%c0_0] : memref<24xi32, #tpu.memory_space<smem>>
    %2 = arith.index_cast %0 : i32 to index
    %c0_1 = arith.constant 0 : index
    %3 = vector.load %arg2[%2, %c0_1] : memref<64x128xf32, #tpu.memory_space<vmem>>, vector<1x128xf32>
    %c0_2 = arith.constant 0 : index
    %c0_3 = arith.constant 0 : index
    %4 = vector.load %arg5[%c0_2, %c0_3] : memref<24x128xf32, #tpu.memory_space<vmem>>, vector<1x128xf32>
    tpu.vector_store %arg5[%c0_2, %c0_3], %3 {strides = array<i32>} : memref<24x128xf32, #tpu.memory_space<vmem>>, vector<1x128xf32>,
    %5 = arith.index_cast %1 : i32 to index
    %c0_4 = arith.constant 0 : index
    %6 = vector.load %arg3[%5, %c0_4] : memref<64x128xf32, #tpu.memory_space<vmem>>, vector<1x128xf32>
    %c0_5 = arith.constant 0 : index
    %c0_6 = arith.constant 0 : index
    %7 = vector.load %arg6[%c0_5, %c0_6] : memref<24x128xf32, #tpu.memory_space<vmem>>, vector<1x128xf32>
    tpu.vector_store %arg6[%c0_5, %c0_6], %6 {strides = array<i32>} : memref<24x128xf32, #tpu.memory_space<vmem>>, vector<1x128xf32>,
    %c1 = arith.constant 1 : index
    %8 = memref.load %arg0[%c1] : memref<24xi32, #tpu.memory_space<smem>>
    %c1_7 = arith.constant 1 : index
    %9 = memref.load %arg1[%c1_7] : memref<24xi32, #tpu.memory_space<smem>>
    %10 = arith.index_cast %8 : i32 to index
    %c0_8 = arith.constant 0 : index
    %11 = vector.load %arg2[%10, %c0_8] : memref<64x128xf32, #tpu.memory_space<vmem>>, vector<1x128xf32>
    %c1_9 = arith.constant 1 : index
    %c0_10 = arith.constant 0 : index
    %12 = vector.load %arg5[%c1_9, %c0_10] : memref<24x128xf32, #tpu.memory_space<vmem>>, vector<1x128xf32>
    tpu.vector_store %arg5[%c1_9, %c0_10], %11 {strides = array<i32>} : memref<24x128xf32, #tpu.memory_space<vmem>>, vector<1x128xf32>,
    %13 = arith.index_cast %9 : i32 to index
    %c0_11 = arith.constant 0 : index
    %14 = vector.load %arg3[%13, %c0_11] : memref<64x128xf32, #tpu.memory_space<vmem>>, vector<1x128xf32>
    %c1_12 = arith.constant 1 : index
    %c0_13 = arith.constant 0 : index
    %15 = vector.load %arg6[%c1_12, %c0_13] : memref<24x128xf32, #tpu.memory_space<vmem>>, vector<1x128xf32>
    tpu.vector_store %arg6[%c1_12, %c0_13], %14 {strides = array<i32>} : memref<24x128xf32, #tpu.memory_space<vmem>>, vector<1x128xf32>,
    %c2 = arith.constant 2 : index
    %16 = memref.load %arg0[%c2] : memref<24xi32, #tpu.memory_space<smem>>
    %c2_14 = arith.constant 2 : index
    %17 = memref.load %arg1[%c2_14] : memref<24xi32, #tpu.memory_space<smem>>
    %18 = arith.index_cast %16 : i32 to index
    %c0_15 = arith.constant 0 : index
    %19 = vector.load %arg2[%18, %c0_15] : memref<64x128xf32, #tpu.memory_space<vmem>>, vector<1x128xf32>
    %c2_16 = arith.constant 2 : index
    %c0_17 = arith.constant 0 : index
    %20 = vector.load %arg5[%c2_16, %c0_17] : memref<24x128xf32, #tpu.memory_space<vmem>>, vector<1x128xf32>
    tpu.vector_store %arg5[%c2_16, %c0_17], %19 {strides = array<i32>} : memref<24x128xf32, #tpu.memory_space<vmem>>, vector<1x128xf32>,
    %21 = arith.index_cast %17 : i32 to index
    %c0_18 = arith.constant 0 : index
    %22 = vector.load %arg3[%21, %c0_18] : memref<64x128xf32, #tpu.memory_space<vmem>>, vector<1x128xf32>
    %c2_19 = arith.constant 2 : index
    %c0_20 = arith.constant 0 : index
    %23 = vector.load %arg6[%c2_19, %c0_20] : memref<24x128xf32, #tpu.memory_space<vmem>>, vector<1x128xf32>
    tpu.vector_store %arg6[%c2_19, %c0_20], %22 {strides = array<i32>} : memref<24x128xf32, #tpu.memory_space<vmem>>, vector<1x128xf32>,
    %c3 = arith.constant 3 : index
    %24 = memref.load %arg0[%c3] : memref<24xi32, #tpu.memory_space<smem>>
    %c3_21 = arith.constant 3 : index
    %25 = memref.load %arg1[%c3_21] : memref<24xi32, #tpu.memory_space<smem>>
    %26 = arith.index_cast %24 : i32 to index
    %c0_22 = arith.constant 0 : index
    %27 = vector.load %arg2[%26, %c0_22] : memref<64x128xf32, #tpu.memory_space<vmem>>, vector<1x128xf32>
    %c3_23 = arith.constant 3 : index
    %c0_24 = arith.constant 0 : index
    %28 = vector.load %arg5[%c3_23, %c0_24] : memref<24x128xf32, #tpu.memory_space<vmem>>, vector<1x128xf32>
    tpu.vector_store %arg5[%c3_23, %c0_24], %27 {strides = array<i32>} : memref<24x128xf32, #tpu.memory_space<vmem>>, vector<1x128xf32>,
    %29 = arith.index_cast %25 : i32 to index
    %c0_25 = arith.constant 0 : index
    %30 = vector.load %arg3[%29, %c0_25] : memref<64x128xf32, #tpu.memory_space<vmem>>, vector<1x128xf32>
    %c3_26 = arith.constant 3 : index
    %c0_27 = arith.constant 0 : index
    %31 = vector.load %arg6[%c3_26, %c0_27] : memref<24x128xf32, #tpu.memory_space<vmem>>, vector<1x128xf32>
    tpu.vector_store %arg6[%c3_26, %c0_27], %30 {strides = array<i32>} : memref<24x128xf32, #tpu.memory_space<vmem>>, vector<1x128xf32>,
    %c4 = arith.constant 4 : index
    %32 = memref.load %arg0[%c4] : memref<24xi32, #tpu.memory_space<smem>>
    %c4_28 = arith.constant 4 : index
    %33 = memref.load %arg1[%c4_28] : memref<24xi32, #tpu.memory_space<smem>>
    %34 = arith.index_cast %32 : i32 to index
    %c0_29 = arith.constant 0 : index
    %35 = vector.load %arg2[%34, %c0_29] : memref<64x128xf32, #tpu.memory_space<vmem>>, vector<1x128xf32>
    %c4_30 = arith.constant 4 : index
    %c0_31 = arith.constant 0 : index
    %36 = vector.load %arg5[%c4_30, %c0_31] : memref<24x128xf32, #tpu.memory_space<vmem>>, vector<1x128xf32>
    tpu.vector_store %arg5[%c4_30, %c0_31], %35 {strides = array<i32>} : memref<24x128xf32, #tpu.memory_space<vmem>>, vector<1x128xf32>,
    %37 = arith.index_cast %33 : i32 to index
    %c0_32 = arith.constant 0 : index
    %38 = vector.load %arg3[%37, %c0_32] : memref<64x128xf32, #tpu.memory_space<vmem>>, vector<1x128xf32>
    %c4_33 = arith.constant 4 : index
    %c0_34 = arith.constant 0 : index
    %39 = vector.load %arg6[%c4_33, %c0_34] : memref<24x128xf32, #tpu.memory_space<vmem>>, vector<1x128xf32>
    tpu.vector_store %arg6[%c4_33, %c0_34], %38 {strides = array<i32>} : memref<24x128xf32, #tpu.memory_space<vmem>>, vector<1x128xf32>,
    %c5 = arith.constant 5 : index
    %40 = memref.load %arg0[%c5] : memref<24xi32, #tpu.memory_space<smem>>
    %c5_35 = arith.constant 5 : index
    %41 = memref.load %arg1[%c5_35] : memref<24xi32, #tpu.memory_space<smem>>
    %42 = arith.index_cast %40 : i32 to index
    %c0_36 = arith.constant 0 : index
    %43 = vector.load %arg2[%42, %c0_36] : memref<64x128xf32, #tpu.memory_space<vmem>>, vector<1x128xf32>
    %c5_37 = arith.constant 5 : index
    %c0_38 = arith.constant 0 : index
    %44 = vector.load %arg5[%c5_37, %c0_38] : memref<24x128xf32, #tpu.memory_space<vmem>>, vector<1x128xf32>
    tpu.vector_store %arg5[%c5_37, %c0_38], %43 {strides = array<i32>} : memref<24x128xf32, #tpu.memory_space<vmem>>, vector<1x128xf32>,
    %45 = arith.index_cast %41 : i32 to index
    %c0_39 = arith.constant 0 : index
    %46 = vector.load %arg3[%45, %c0_39] : memref<64x128xf32, #tpu.memory_space<vmem>>, vector<1x128xf32>
    %c5_40 = arith.constant 5 : index
    %c0_41 = arith.constant 0 : index
    %47 = vector.load %arg6[%c5_40, %c0_41] : memref<24x128xf32, #tpu.memory_space<vmem>>, vector<1x128xf32>
    tpu.vector_store %arg6[%c5_40, %c0_41], %46 {strides = array<i32>} : memref<24x128xf32, #tpu.memory_space<vmem>>, vector<1x128xf32>,
    %c6 = arith.constant 6 : index
    %48 = memref.load %arg0[%c6] : memref<24xi32, #tpu.memory_space<smem>>
    %c6_42 = arith.constant 6 : index
    %49 = memref.load %arg1[%c6_42] : memref<24xi32, #tpu.memory_space<smem>>
    %50 = arith.index_cast %48 : i32 to index
    %c0_43 = arith.constant 0 : index
    %51 = vector.load %arg2[%50, %c0_43] : memref<64x128xf32, #tpu.memory_space<vmem>>, vector<1x128xf32>
    %c6_44 = arith.constant 6 : index
    %c0_45 = arith.constant 0 : index
    %52 = vector.load %arg5[%c6_44, %c0_45] : memref<24x128xf32, #tpu.memory_space<vmem>>, vector<1x128xf32>
    tpu.vector_store %arg5[%c6_44, %c0_45], %51 {strides = array<i32>} : memref<24x128xf32, #tpu.memory_space<vmem>>, vector<1x128xf32>,
    %53 = arith.index_cast %49 : i32 to index
    %c0_46 = arith.constant 0 : index
    %54 = vector.load %arg3[%53, %c0_46] : memref<64x128xf32, #tpu.memory_space<vmem>>, vector<1x128xf32>
    %c6_47 = arith.constant 6 : index
    %c0_48 = arith.constant 0 : index
    %55 = vector.load %arg6[%c6_47, %c0_48] : memref<24x128xf32, #tpu.memory_space<vmem>>, vector<1x128xf32>
    tpu.vector_store %arg6[%c6_47, %c0_48], %54 {strides = array<i32>} : memref<24x128xf32, #tpu.memory_space<vmem>>, vector<1x128xf32>,
    %c7 = arith.constant 7 : index
    %56 = memref.load %arg0[%c7] : memref<24xi32, #tpu.memory_space<smem>>
    %c7_49 = arith.constant 7 : index
    %57 = memref.load %arg1[%c7_49] : memref<24xi32, #tpu.memory_space<smem>>
    %58 = arith.index_cast %56 : i32 to index
    %c0_50 = arith.constant 0 : index
    %59 = vector.load %arg2[%58, %c0_50] : memref<64x128xf32, #tpu.memory_space<vmem>>, vector<1x128xf32>
    %c7_51 = arith.constant 7 : index
    %c0_52 = arith.constant 0 : index
    %60 = vector.load %arg5[%c7_51, %c0_52] : memref<24x128xf32, #tpu.memory_space<vmem>>, vector<1x128xf32>
    tpu.vector_store %arg5[%c7_51, %c0_52], %59 {strides = array<i32>} : memref<24x128xf32, #tpu.memory_space<vmem>>, vector<1x128xf32>,
    %61 = arith.index_cast %57 : i32 to index
    %c0_53 = arith.constant 0 : index
    %62 = vector.load %arg3[%61, %c0_53] : memref<64x128xf32, #tpu.memory_space<vmem>>, vector<1x128xf32>
    %c7_54 = arith.constant 7 : index
    %c0_55 = arith.constant 0 : index
    %63 = vector.load %arg6[%c7_54, %c0_55] : memref<24x128xf32, #tpu.memory_space<vmem>>, vector<1x128xf32>
    tpu.vector_store %arg6[%c7_54, %c0_55], %62 {strides = array<i32>} : memref<24x128xf32, #tpu.memory_space<vmem>>, vector<1x128xf32>,
    %c8 = arith.constant 8 : index
    %64 = memref.load %arg0[%c8] : memref<24xi32, #tpu.memory_space<smem>>
    %c8_56 = arith.constant 8 : index
    %65 = memref.load %arg1[%c8_56] : memref<24xi32, #tpu.memory_space<smem>>
    %66 = arith.index_cast %64 : i32 to index
    %c0_57 = arith.constant 0 : index
    %67 = vector.load %arg2[%66, %c0_57] : memref<64x128xf32, #tpu.memory_space<vmem>>, vector<1x128xf32>
    %c8_58 = arith.constant 8 : index
    %c0_59 = arith.constant 0 : index
    %68 = vector.load %arg5[%c8_58, %c0_59] : memref<24x128xf32, #tpu.memory_space<vmem>>, vector<1x128xf32>
    tpu.vector_store %arg5[%c8_58, %c0_59], %67 {strides = array<i32>} : memref<24x128xf32, #tpu.memory_space<vmem>>, vector<1x128xf32>,
    %69 = arith.index_cast %65 : i32 to index
    %c0_60 = arith.constant 0 : index
    %70 = vector.load %arg3[%69, %c0_60] : memref<64x128xf32, #tpu.memory_space<vmem>>, vector<1x128xf32>
    %c8_61 = arith.constant 8 : index
    %c0_62 = arith.constant 0 : index
    %71 = vector.load %arg6[%c8_61, %c0_62] : memref<24x128xf32, #tpu.memory_space<vmem>>, vector<1x128xf32>
    tpu.vector_store %arg6[%c8_61, %c0_62], %70 {strides = array<i32>} : memref<24x128xf32, #tpu.memory_space<vmem>>, vector<1x128xf32>,
    %c9 = arith.constant 9 : index
    %72 = memref.load %arg0[%c9] : memref<24xi32, #tpu.memory_space<smem>>
    %c9_63 = arith.constant 9 : index
    %73 = memref.load %arg1[%c9_63] : memref<24xi32, #tpu.memory_space<smem>>
    %74 = arith.index_cast %72 : i32 to index
    %c0_64 = arith.constant 0 : index
    %75 = vector.load %arg2[%74, %c0_64] : memref<64x128xf32, #tpu.memory_space<vmem>>, vector<1x128xf32>
    %c9_65 = arith.constant 9 : index
    %c0_66 = arith.constant 0 : index
    %76 = vector.load %arg5[%c9_65, %c0_66] : memref<24x128xf32, #tpu.memory_space<vmem>>, vector<1x128xf32>
    tpu.vector_store %arg5[%c9_65, %c0_66], %75 {strides = array<i32>} : memref<24x128xf32, #tpu.memory_space<vmem>>, vector<1x128xf32>,
    %77 = arith.index_cast %73 : i32 to index
    %c0_67 = arith.constant 0 : index
    %78 = vector.load %arg3[%77, %c0_67] : memref<64x128xf32, #tpu.memory_space<vmem>>, vector<1x128xf32>
    %c9_68 = arith.constant 9 : index
    %c0_69 = arith.constant 0 : index
    %79 = vector.load %arg6[%c9_68, %c0_69] : memref<24x128xf32, #tpu.memory_space<vmem>>, vector<1x128xf32>
    tpu.vector_store %arg6[%c9_68, %c0_69], %78 {strides = array<i32>} : memref<24x128xf32, #tpu.memory_space<vmem>>, vector<1x128xf32>,
    %c10 = arith.constant 10 : index
    %80 = memref.load %arg0[%c10] : memref<24xi32, #tpu.memory_space<smem>>
    %c10_70 = arith.constant 10 : index
    %81 = memref.load %arg1[%c10_70] : memref<24xi32, #tpu.memory_space<smem>>
    %82 = arith.index_cast %80 : i32 to index
    %c0_71 = arith.constant 0 : index
    %83 = vector.load %arg2[%82, %c0_71] : memref<64x128xf32, #tpu.memory_space<vmem>>, vector<1x128xf32>
    %c10_72 = arith.constant 10 : index
    %c0_73 = arith.constant 0 : index
    %84 = vector.load %arg5[%c10_72, %c0_73] : memref<24x128xf32, #tpu.memory_space<vmem>>, vector<1x128xf32>
    tpu.vector_store %arg5[%c10_72, %c0_73], %83 {strides = array<i32>} : memref<24x128xf32, #tpu.memory_space<vmem>>, vector<1x128xf32>,
    %85 = arith.index_cast %81 : i32 to index
    %c0_74 = arith.constant 0 : index
    %86 = vector.load %arg3[%85, %c0_74] : memref<64x128xf32, #tpu.memory_space<vmem>>, vector<1x128xf32>
    %c10_75 = arith.constant 10 : index
    %c0_76 = arith.constant 0 : index
    %87 = vector.load %arg6[%c10_75, %c0_76] : memref<24x128xf32, #tpu.memory_space<vmem>>, vector<1x128xf32>
    tpu.vector_store %arg6[%c10_75, %c0_76], %86 {strides = array<i32>} : memref<24x128xf32, #tpu.memory_space<vmem>>, vector<1x128xf32>,
    %c11 = arith.constant 11 : index
    %88 = memref.load %arg0[%c11] : memref<24xi32, #tpu.memory_space<smem>>
    %c11_77 = arith.constant 11 : index
    %89 = memref.load %arg1[%c11_77] : memref<24xi32, #tpu.memory_space<smem>>
    %90 = arith.index_cast %88 : i32 to index
    %c0_78 = arith.constant 0 : index
    %91 = vector.load %arg2[%90, %c0_78] : memref<64x128xf32, #tpu.memory_space<vmem>>, vector<1x128xf32>
    %c11_79 = arith.constant 11 : index
    %c0_80 = arith.constant 0 : index
    %92 = vector.load %arg5[%c11_79, %c0_80] : memref<24x128xf32, #tpu.memory_space<vmem>>, vector<1x128xf32>
    tpu.vector_store %arg5[%c11_79, %c0_80], %91 {strides = array<i32>} : memref<24x128xf32, #tpu.memory_space<vmem>>, vector<1x128xf32>,
    %93 = arith.index_cast %89 : i32 to index
    %c0_81 = arith.constant 0 : index
    %94 = vector.load %arg3[%93, %c0_81] : memref<64x128xf32, #tpu.memory_space<vmem>>, vector<1x128xf32>
    %c11_82 = arith.constant 11 : index
    %c0_83 = arith.constant 0 : index
    %95 = vector.load %arg6[%c11_82, %c0_83] : memref<24x128xf32, #tpu.memory_space<vmem>>, vector<1x128xf32>
    tpu.vector_store %arg6[%c11_82, %c0_83], %94 {strides = array<i32>} : memref<24x128xf32, #tpu.memory_space<vmem>>, vector<1x128xf32>,
    %c12 = arith.constant 12 : index
    %96 = memref.load %arg0[%c12] : memref<24xi32, #tpu.memory_space<smem>>
    %c12_84 = arith.constant 12 : index
    %97 = memref.load %arg1[%c12_84] : memref<24xi32, #tpu.memory_space<smem>>
    %98 = arith.index_cast %96 : i32 to index
    %c0_85 = arith.constant 0 : index
    %99 = vector.load %arg2[%98, %c0_85] : memref<64x128xf32, #tpu.memory_space<vmem>>, vector<1x128xf32>
    %c12_86 = arith.constant 12 : index
    %c0_87 = arith.constant 0 : index
    %100 = vector.load %arg5[%c12_86, %c0_87] : memref<24x128xf32, #tpu.memory_space<vmem>>, vector<1x128xf32>
    tpu.vector_store %arg5[%c12_86, %c0_87], %99 {strides = array<i32>} : memref<24x128xf32, #tpu.memory_space<vmem>>, vector<1x128xf32>,
    %101 = arith.index_cast %97 : i32 to index
    %c0_88 = arith.constant 0 : index
    %102 = vector.load %arg3[%101, %c0_88] : memref<64x128xf32, #tpu.memory_space<vmem>>, vector<1x128xf32>
    %c12_89 = arith.constant 12 : index
    %c0_90 = arith.constant 0 : index
    %103 = vector.load %arg6[%c12_89, %c0_90] : memref<24x128xf32, #tpu.memory_space<vmem>>, vector<1x128xf32>
    tpu.vector_store %arg6[%c12_89, %c0_90], %102 {strides = array<i32>} : memref<24x128xf32, #tpu.memory_space<vmem>>, vector<1x128xf32>,
    %c13 = arith.constant 13 : index
    %104 = memref.load %arg0[%c13] : memref<24xi32, #tpu.memory_space<smem>>
    %c13_91 = arith.constant 13 : index
    %105 = memref.load %arg1[%c13_91] : memref<24xi32, #tpu.memory_space<smem>>
    %106 = arith.index_cast %104 : i32 to index
    %c0_92 = arith.constant 0 : index
    %107 = vector.load %arg2[%106, %c0_92] : memref<64x128xf32, #tpu.memory_space<vmem>>, vector<1x128xf32>
    %c13_93 = arith.constant 13 : index
    %c0_94 = arith.constant 0 : index
    %108 = vector.load %arg5[%c13_93, %c0_94] : memref<24x128xf32, #tpu.memory_space<vmem>>, vector<1x128xf32>
    tpu.vector_store %arg5[%c13_93, %c0_94], %107 {strides = array<i32>} : memref<24x128xf32, #tpu.memory_space<vmem>>, vector<1x128xf32>,
    %109 = arith.index_cast %105 : i32 to index
    %c0_95 = arith.constant 0 : index
    %110 = vector.load %arg3[%109, %c0_95] : memref<64x128xf32, #tpu.memory_space<vmem>>, vector<1x128xf32>
    %c13_96 = arith.constant 13 : index
    %c0_97 = arith.constant 0 : index
    %111 = vector.load %arg6[%c13_96, %c0_97] : memref<24x128xf32, #tpu.memory_space<vmem>>, vector<1x128xf32>
    tpu.vector_store %arg6[%c13_96, %c0_97], %110 {strides = array<i32>} : memref<24x128xf32, #tpu.memory_space<vmem>>, vector<1x128xf32>,
    %c14 = arith.constant 14 : index
    %112 = memref.load %arg0[%c14] : memref<24xi32, #tpu.memory_space<smem>>
    %c14_98 = arith.constant 14 : index
    %113 = memref.load %arg1[%c14_98] : memref<24xi32, #tpu.memory_space<smem>>
    %114 = arith.index_cast %112 : i32 to index
    %c0_99 = arith.constant 0 : index
    %115 = vector.load %arg2[%114, %c0_99] : memref<64x128xf32, #tpu.memory_space<vmem>>, vector<1x128xf32>
    %c14_100 = arith.constant 14 : index
    %c0_101 = arith.constant 0 : index
    %116 = vector.load %arg5[%c14_100, %c0_101] : memref<24x128xf32, #tpu.memory_space<vmem>>, vector<1x128xf32>
    tpu.vector_store %arg5[%c14_100, %c0_101], %115 {strides = array<i32>} : memref<24x128xf32, #tpu.memory_space<vmem>>, vector<1x128xf32>,
    %117 = arith.index_cast %113 : i32 to index
    %c0_102 = arith.constant 0 : index
    %118 = vector.load %arg3[%117, %c0_102] : memref<64x128xf32, #tpu.memory_space<vmem>>, vector<1x128xf32>
    %c14_103 = arith.constant 14 : index
    %c0_104 = arith.constant 0 : index
    %119 = vector.load %arg6[%c14_103, %c0_104] : memref<24x128xf32, #tpu.memory_space<vmem>>, vector<1x128xf32>
    tpu.vector_store %arg6[%c14_103, %c0_104], %118 {strides = array<i32>} : memref<24x128xf32, #tpu.memory_space<vmem>>, vector<1x128xf32>,
    %c15 = arith.constant 15 : index
    %120 = memref.load %arg0[%c15] : memref<24xi32, #tpu.memory_space<smem>>
    %c15_105 = arith.constant 15 : index
    %121 = memref.load %arg1[%c15_105] : memref<24xi32, #tpu.memory_space<smem>>
    %122 = arith.index_cast %120 : i32 to index
    %c0_106 = arith.constant 0 : index
    %123 = vector.load %arg2[%122, %c0_106] : memref<64x128xf32, #tpu.memory_space<vmem>>, vector<1x128xf32>
    %c15_107 = arith.constant 15 : index
    %c0_108 = arith.constant 0 : index
    %124 = vector.load %arg5[%c15_107, %c0_108] : memref<24x128xf32, #tpu.memory_space<vmem>>, vector<1x128xf32>
    tpu.vector_store %arg5[%c15_107, %c0_108], %123 {strides = array<i32>} : memref<24x128xf32, #tpu.memory_space<vmem>>, vector<1x128xf32>,
    %125 = arith.index_cast %121 : i32 to index
    %c0_109 = arith.constant 0 : index
    %126 = vector.load %arg3[%125, %c0_109] : memref<64x128xf32, #tpu.memory_space<vmem>>, vector<1x128xf32>
    %c15_110 = arith.constant 15 : index
    %c0_111 = arith.constant 0 : index
    %127 = vector.load %arg6[%c15_110, %c0_111] : memref<24x128xf32, #tpu.memory_space<vmem>>, vector<1x128xf32>
    tpu.vector_store %arg6[%c15_110, %c0_111], %126 {strides = array<i32>} : memref<24x128xf32, #tpu.memory_space<vmem>>, vector<1x128xf32>,
    %c16 = arith.constant 16 : index
    %128 = memref.load %arg0[%c16] : memref<24xi32, #tpu.memory_space<smem>>
    %c16_112 = arith.constant 16 : index
    %129 = memref.load %arg1[%c16_112] : memref<24xi32, #tpu.memory_space<smem>>
    %130 = arith.index_cast %128 : i32 to index
    %c0_113 = arith.constant 0 : index
    %131 = vector.load %arg2[%130, %c0_113] : memref<64x128xf32, #tpu.memory_space<vmem>>, vector<1x128xf32>
    %c16_114 = arith.constant 16 : index
    %c0_115 = arith.constant 0 : index
    %132 = vector.load %arg5[%c16_114, %c0_115] : memref<24x128xf32, #tpu.memory_space<vmem>>, vector<1x128xf32>
    tpu.vector_store %arg5[%c16_114, %c0_115], %131 {strides = array<i32>} : memref<24x128xf32, #tpu.memory_space<vmem>>, vector<1x128xf32>,
    %133 = arith.index_cast %129 : i32 to index
    %c0_116 = arith.constant 0 : index
    %134 = vector.load %arg3[%133, %c0_116] : memref<64x128xf32, #tpu.memory_space<vmem>>, vector<1x128xf32>
    %c16_117 = arith.constant 16 : index
    %c0_118 = arith.constant 0 : index
    %135 = vector.load %arg6[%c16_117, %c0_118] : memref<24x128xf32, #tpu.memory_space<vmem>>, vector<1x128xf32>
    tpu.vector_store %arg6[%c16_117, %c0_118], %134 {strides = array<i32>} : memref<24x128xf32, #tpu.memory_space<vmem>>, vector<1x128xf32>,
    %c17 = arith.constant 17 : index
    %136 = memref.load %arg0[%c17] : memref<24xi32, #tpu.memory_space<smem>>
    %c17_119 = arith.constant 17 : index
    %137 = memref.load %arg1[%c17_119] : memref<24xi32, #tpu.memory_space<smem>>
    %138 = arith.index_cast %136 : i32 to index
    %c0_120 = arith.constant 0 : index
    %139 = vector.load %arg2[%138, %c0_120] : memref<64x128xf32, #tpu.memory_space<vmem>>, vector<1x128xf32>
    %c17_121 = arith.constant 17 : index
    %c0_122 = arith.constant 0 : index
    %140 = vector.load %arg5[%c17_121, %c0_122] : memref<24x128xf32, #tpu.memory_space<vmem>>, vector<1x128xf32>
    tpu.vector_store %arg5[%c17_121, %c0_122], %139 {strides = array<i32>} : memref<24x128xf32, #tpu.memory_space<vmem>>, vector<1x128xf32>,
    %141 = arith.index_cast %137 : i32 to index
    %c0_123 = arith.constant 0 : index
    %142 = vector.load %arg3[%141, %c0_123] : memref<64x128xf32, #tpu.memory_space<vmem>>, vector<1x128xf32>
    %c17_124 = arith.constant 17 : index
    %c0_125 = arith.constant 0 : index
    %143 = vector.load %arg6[%c17_124, %c0_125] : memref<24x128xf32, #tpu.memory_space<vmem>>, vector<1x128xf32>
    tpu.vector_store %arg6[%c17_124, %c0_125], %142 {strides = array<i32>} : memref<24x128xf32, #tpu.memory_space<vmem>>, vector<1x128xf32>,
    %c18 = arith.constant 18 : index
    %144 = memref.load %arg0[%c18] : memref<24xi32, #tpu.memory_space<smem>>
    %c18_126 = arith.constant 18 : index
    %145 = memref.load %arg1[%c18_126] : memref<24xi32, #tpu.memory_space<smem>>
    %146 = arith.index_cast %144 : i32 to index
    %c0_127 = arith.constant 0 : index
    %147 = vector.load %arg2[%146, %c0_127] : memref<64x128xf32, #tpu.memory_space<vmem>>, vector<1x128xf32>
    %c18_128 = arith.constant 18 : index
    %c0_129 = arith.constant 0 : index
    %148 = vector.load %arg5[%c18_128, %c0_129] : memref<24x128xf32, #tpu.memory_space<vmem>>, vector<1x128xf32>
    tpu.vector_store %arg5[%c18_128, %c0_129], %147 {strides = array<i32>} : memref<24x128xf32, #tpu.memory_space<vmem>>, vector<1x128xf32>,
    %149 = arith.index_cast %145 : i32 to index
    %c0_130 = arith.constant 0 : index
    %150 = vector.load %arg3[%149, %c0_130] : memref<64x128xf32, #tpu.memory_space<vmem>>, vector<1x128xf32>
    %c18_131 = arith.constant 18 : index
    %c0_132 = arith.constant 0 : index
    %151 = vector.load %arg6[%c18_131, %c0_132] : memref<24x128xf32, #tpu.memory_space<vmem>>, vector<1x128xf32>
    tpu.vector_store %arg6[%c18_131, %c0_132], %150 {strides = array<i32>} : memref<24x128xf32, #tpu.memory_space<vmem>>, vector<1x128xf32>,
    %c19 = arith.constant 19 : index
    %152 = memref.load %arg0[%c19] : memref<24xi32, #tpu.memory_space<smem>>
    %c19_133 = arith.constant 19 : index
    %153 = memref.load %arg1[%c19_133] : memref<24xi32, #tpu.memory_space<smem>>
    %154 = arith.index_cast %152 : i32 to index
    %c0_134 = arith.constant 0 : index
    %155 = vector.load %arg2[%154, %c0_134] : memref<64x128xf32, #tpu.memory_space<vmem>>, vector<1x128xf32>
    %c19_135 = arith.constant 19 : index
    %c0_136 = arith.constant 0 : index
    %156 = vector.load %arg5[%c19_135, %c0_136] : memref<24x128xf32, #tpu.memory_space<vmem>>, vector<1x128xf32>
    tpu.vector_store %arg5[%c19_135, %c0_136], %155 {strides = array<i32>} : memref<24x128xf32, #tpu.memory_space<vmem>>, vector<1x128xf32>,
    %157 = arith.index_cast %153 : i32 to index
    %c0_137 = arith.constant 0 : index
    %158 = vector.load %arg3[%157, %c0_137] : memref<64x128xf32, #tpu.memory_space<vmem>>, vector<1x128xf32>
    %c19_138 = arith.constant 19 : index
    %c0_139 = arith.constant 0 : index
    %159 = vector.load %arg6[%c19_138, %c0_139] : memref<24x128xf32, #tpu.memory_space<vmem>>, vector<1x128xf32>
    tpu.vector_store %arg6[%c19_138, %c0_139], %158 {strides = array<i32>} : memref<24x128xf32, #tpu.memory_space<vmem>>, vector<1x128xf32>,
    %c20 = arith.constant 20 : index
    %160 = memref.load %arg0[%c20] : memref<24xi32, #tpu.memory_space<smem>>
    %c20_140 = arith.constant 20 : index
    %161 = memref.load %arg1[%c20_140] : memref<24xi32, #tpu.memory_space<smem>>
    %162 = arith.index_cast %160 : i32 to index
    %c0_141 = arith.constant 0 : index
    %163 = vector.load %arg2[%162, %c0_141] : memref<64x128xf32, #tpu.memory_space<vmem>>, vector<1x128xf32>
    %c20_142 = arith.constant 20 : index
    %c0_143 = arith.constant 0 : index
    %164 = vector.load %arg5[%c20_142, %c0_143] : memref<24x128xf32, #tpu.memory_space<vmem>>, vector<1x128xf32>
    tpu.vector_store %arg5[%c20_142, %c0_143], %163 {strides = array<i32>} : memref<24x128xf32, #tpu.memory_space<vmem>>, vector<1x128xf32>,
    %165 = arith.index_cast %161 : i32 to index
    %c0_144 = arith.constant 0 : index
    %166 = vector.load %arg3[%165, %c0_144] : memref<64x128xf32, #tpu.memory_space<vmem>>, vector<1x128xf32>
    %c20_145 = arith.constant 20 : index
    %c0_146 = arith.constant 0 : index
    %167 = vector.load %arg6[%c20_145, %c0_146] : memref<24x128xf32, #tpu.memory_space<vmem>>, vector<1x128xf32>
    tpu.vector_store %arg6[%c20_145, %c0_146], %166 {strides = array<i32>} : memref<24x128xf32, #tpu.memory_space<vmem>>, vector<1x128xf32>,
    %c21 = arith.constant 21 : index
    %168 = memref.load %arg0[%c21] : memref<24xi32, #tpu.memory_space<smem>>
    %c21_147 = arith.constant 21 : index
    %169 = memref.load %arg1[%c21_147] : memref<24xi32, #tpu.memory_space<smem>>
    %170 = arith.index_cast %168 : i32 to index
    %c0_148 = arith.constant 0 : index
    %171 = vector.load %arg2[%170, %c0_148] : memref<64x128xf32, #tpu.memory_space<vmem>>, vector<1x128xf32>
    %c21_149 = arith.constant 21 : index
    %c0_150 = arith.constant 0 : index
    %172 = vector.load %arg5[%c21_149, %c0_150] : memref<24x128xf32, #tpu.memory_space<vmem>>, vector<1x128xf32>
    tpu.vector_store %arg5[%c21_149, %c0_150], %171 {strides = array<i32>} : memref<24x128xf32, #tpu.memory_space<vmem>>, vector<1x128xf32>,
    %173 = arith.index_cast %169 : i32 to index
    %c0_151 = arith.constant 0 : index
    %174 = vector.load %arg3[%173, %c0_151] : memref<64x128xf32, #tpu.memory_space<vmem>>, vector<1x128xf32>
    %c21_152 = arith.constant 21 : index
    %c0_153 = arith.constant 0 : index
    %175 = vector.load %arg6[%c21_152, %c0_153] : memref<24x128xf32, #tpu.memory_space<vmem>>, vector<1x128xf32>
    tpu.vector_store %arg6[%c21_152, %c0_153], %174 {strides = array<i32>} : memref<24x128xf32, #tpu.memory_space<vmem>>, vector<1x128xf32>,
    %c22 = arith.constant 22 : index
    %176 = memref.load %arg0[%c22] : memref<24xi32, #tpu.memory_space<smem>>
    %c22_154 = arith.constant 22 : index
    %177 = memref.load %arg1[%c22_154] : memref<24xi32, #tpu.memory_space<smem>>
    %178 = arith.index_cast %176 : i32 to index
    %c0_155 = arith.constant 0 : index
    %179 = vector.load %arg2[%178, %c0_155] : memref<64x128xf32, #tpu.memory_space<vmem>>, vector<1x128xf32>
    %c22_156 = arith.constant 22 : index
    %c0_157 = arith.constant 0 : index
    %180 = vector.load %arg5[%c22_156, %c0_157] : memref<24x128xf32, #tpu.memory_space<vmem>>, vector<1x128xf32>
    tpu.vector_store %arg5[%c22_156, %c0_157], %179 {strides = array<i32>} : memref<24x128xf32, #tpu.memory_space<vmem>>, vector<1x128xf32>,
    %181 = arith.index_cast %177 : i32 to index
    %c0_158 = arith.constant 0 : index
    %182 = vector.load %arg3[%181, %c0_158] : memref<64x128xf32, #tpu.memory_space<vmem>>, vector<1x128xf32>
    %c22_159 = arith.constant 22 : index
    %c0_160 = arith.constant 0 : index
    %183 = vector.load %arg6[%c22_159, %c0_160] : memref<24x128xf32, #tpu.memory_space<vmem>>, vector<1x128xf32>
    tpu.vector_store %arg6[%c22_159, %c0_160], %182 {strides = array<i32>} : memref<24x128xf32, #tpu.memory_space<vmem>>, vector<1x128xf32>,
    %c23 = arith.constant 23 : index
    %184 = memref.load %arg0[%c23] : memref<24xi32, #tpu.memory_space<smem>>
    %c23_161 = arith.constant 23 : index
    %185 = memref.load %arg1[%c23_161] : memref<24xi32, #tpu.memory_space<smem>>
    %186 = arith.index_cast %184 : i32 to index
    %c0_162 = arith.constant 0 : index
    %187 = vector.load %arg2[%186, %c0_162] : memref<64x128xf32, #tpu.memory_space<vmem>>, vector<1x128xf32>
    %c23_163 = arith.constant 23 : index
    %c0_164 = arith.constant 0 : index
    %188 = vector.load %arg5[%c23_163, %c0_164] : memref<24x128xf32, #tpu.memory_space<vmem>>, vector<1x128xf32>
    tpu.vector_store %arg5[%c23_163, %c0_164], %187 {strides = array<i32>} : memref<24x128xf32, #tpu.memory_space<vmem>>, vector<1x128xf32>,
    %189 = arith.index_cast %185 : i32 to index
    %c0_165 = arith.constant 0 : index
    %190 = vector.load %arg3[%189, %c0_165] : memref<64x128xf32, #tpu.memory_space<vmem>>, vector<1x128xf32>
    %c23_166 = arith.constant 23 : index
    %c0_167 = arith.constant 0 : index
    %191 = vector.load %arg6[%c23_166, %c0_167] : memref<24x128xf32, #tpu.memory_space<vmem>>, vector<1x128xf32>
    tpu.vector_store %arg6[%c23_166, %c0_167], %190 {strides = array<i32>} : memref<24x128xf32, #tpu.memory_space<vmem>>, vector<1x128xf32>,
    %c0_168 = arith.constant 0 : index
    %c0_169 = arith.constant 0 : index
    %192 = vector.load %arg5[%c0_168, %c0_169] : memref<24x128xf32, #tpu.memory_space<vmem>>, vector<24x128xf32>
    %c0_170 = arith.constant 0 : index
    %c0_171 = arith.constant 0 : index
    %193 = vector.load %arg6[%c0_170, %c0_171] : memref<24x128xf32, #tpu.memory_space<vmem>>, vector<24x128xf32>
    %194 = arith.mulf %192, %193 : vector<24x128xf32>
    %cst = arith.constant dense<0.000000e+00> : vector<24xf32>
    %195 = vector.multi_reduction <add>, %194, %cst [1] : vector<24x128xf32> to vector<24xf32>
    %196 = vector.shape_cast %195 : vector<24xf32> to vector<24x1xf32>
    %197 = tpu.iota {dimensions = array<i32: 0>} : vector<24x1xi32>
    %c8_i32 = arith.constant 8 : i32
    %198 = vector.broadcast %c8_i32 : i32 to vector<24x1xi32>
    %199 = arith.cmpi slt, %197, %198 : vector<24x1xi32>
    %c24_i32 = arith.constant 24 : i32
    %200 = vector.broadcast %c24_i32 : i32 to vector<24x1xi32>
    %201 = arith.cmpi slt, %197, %200 : vector<24x1xi32>
    %cst_172 = arith.constant 0.000000e+00 : f32
    %202 = vector.broadcast %cst_172 : f32 to vector<24x1xf32>
    %203 = arith.subf %202, %196 : vector<24x1xf32>
    %204 = arith.select %199, %203, %196 : vector<24x1xi1>, vector<24x1xf32>
    %cst_173 = arith.constant 0.000000e+00 : f32
    %205 = vector.broadcast %cst_173 : f32 to vector<24x1xf32>
    %206 = arith.select %201, %204, %205 : vector<24x1xi1>, vector<24x1xf32>
    %cst_174 = arith.constant 0.000000e+00 : f32
    %207 = vector.broadcast %cst_174 : f32 to vector<24x1xf32>
    %208 = arith.maximumf %206, %207 : vector<24x1xf32>
    %209 = math.absf %206 : vector<24x1xf32>
    %cst_175 = arith.constant 0.000000e+00 : f32
    %210 = vector.broadcast %cst_175 : f32 to vector<24x1xf32>
    %211 = arith.subf %210, %209 : vector<24x1xf32>
    %212 = math.exp %211 : vector<24x1xf32>
    %cst_176 = arith.constant 1.000000e+00 : f32
    %213 = vector.broadcast %cst_176 : f32 to vector<24x1xf32>
    %214 = arith.addf %213, %212 : vector<24x1xf32>
    %215 = math.log %214 : vector<24x1xf32>
    %216 = arith.addf %208, %215 : vector<24x1xf32>
    %cst_177 = arith.constant 1.250000e-01 : f32
    %cst_178 = arith.constant 6.250000e-02 : f32
    %217 = vector.broadcast %cst_177 : f32 to vector<24x1xf32>
    %218 = vector.broadcast %cst_178 : f32 to vector<24x1xf32>
    %219 = arith.select %199, %217, %218 : vector<24x1xi1>, vector<24x1xf32>
    %cst_179 = arith.constant 0.000000e+00 : f32
    %220 = vector.broadcast %cst_179 : f32 to vector<24x1xf32>
    %221 = arith.select %201, %219, %220 : vector<24x1xi1>, vector<24x1xf32>
    %222 = arith.mulf %221, %216 : vector<24x1xf32>
    %223 = vector.shape_cast %222 : vector<24x1xf32> to vector<1x24x1xf32>
    %cst_180 = arith.constant dense<0.000000e+00> : vector<1xf32>
    %224 = vector.multi_reduction <add>, %223, %cst_180 [1, 2] : vector<1x24x1xf32> to vector<1xf32>
    %225 = vector.shape_cast %224 : vector<1xf32> to vector<1x1x1xf32>
    %226 = vector.extract %225[0, 0, 0] : f32 from vector<1x1x1xf32>
    %c0_181 = arith.constant 0 : index
    %c0_182 = arith.constant 0 : index
    %227 = memref.load %arg4[%c0_181, %c0_182] : memref<1x1xf32, #tpu.memory_space<smem>>
    memref.store %226, %arg4[%c0_181, %c0_182] : memref<1x1xf32, #tpu.memory_space<smem>>
    return
  }
}

</mosaic_0001>

<bundles_post_ra>
// kernel: tpu_custom_call.1
= control target key start
LH: loop header
LB: loop body
LE: loop exit
PB: predicated region body
PF: predicated region fallthrough
CT: control target
= control target key end

     0   :  { %9 = vsyncpa [#allocation6], 0  ;;  %s644_s0 = inlined_call_operand.hbm [shape: s32[24], index: 0, kind: input, shape index: {}]   ;;  %s645_s1 = inlined_call_operand.vmem [shape: s32[24], index: 1, kind: input, shape index: {}]   ;;  %s646_s2 = inlined_call_operand.hbm [shape: f32[64,128], index: 2, kind: input, shape index: {}]   ;;  %s647_s3 = inlined_call_operand.hbm [shape: f32[64,128], index: 3, kind: input, shape index: {}]   ;;  %s648_s4 = inlined_call_operand.hbm [shape: f32[1,1], index: 4, kind: output, shape index: {}]  }
   0x1   :  { %10 = vsyncpa [#allocation8], 0 }
   0x2   :  { %11 = vsyncpa [#allocation5], 0 }
   0x3   :  { %12 = vsyncpa [#allocation12], 0 }
   0x4   :  { %13 = vsyncpa [#allocation7], 0  ;;  %s28_s17 = sshll.u32 %s645_s1, 4  ;;  %s558_s18 = smov [#allocation4]   ;;  %s29_s17 = int_to_ptr.vmem [resolvable:$true] %s28_s17 }
   0x5   :  { %21 = dma.hbm_to_smem %s644_s0, 16, %s558_s18, [#allocation6]  }
   0x6   :  { %s488_s21 = scalar_lea.vmem %s29_s17, 16  ;;  %p493_p1 = scmp.lt.s32.totalorder %s29_s17, %s29_s17 }
   0x7   :  { %p489_p0 = scmp.ne.s32.totalorder %s29_s17, %s488_s21  ;;  %p494_p2 = scmp.lt.s32.totalorder %s488_s21, %s488_s21 }
   0x9   :  { %p495_p3 = por %p494_p2, %p493_p1 }
   0xb   :  { %p496_p4 = pnand %p495_p3, %p489_p0 }
   0xd   :  { %499 = shalt.err (!%p496_p4)
}
   0xe   :  { %s559_s22 = smov [#allocation9]   ;;  %s560_s23 = smov [#allocation10]  }
   0xf   :  { %31 = dma.vmem_to_smem %s29_s17, 16, %s559_s22, [#allocation8]  }
  0x10   :  { %s37_s24 = sshll.u32 %s560_s23, 4  ;;  %s38_s24 = int_to_ptr.vmem [resolvable:$true] %s37_s24 }
  0x11   :  { %s508_s25 = scalar_lea.vmem %s38_s24, 1024  ;;  %p513_p6 = scmp.lt.s32.totalorder %s38_s24, %s38_s24 }
  0x12   :  { %p509_p5 = scmp.ne.s32.totalorder %s38_s24, %s508_s25  ;;  %p514_p7 = scmp.lt.s32.totalorder %s508_s25, %s508_s25 }
  0x14   :  { %p515_p8 = por %p514_p7, %p513_p6 }
  0x16   :  { %p516_p9 = pnand %p515_p8, %p509_p5 }
  0x18   :  { %519 = shalt.err (!%p516_p9)
}
  0x19   :  { %s561_s0 = smov 128   ;;  %s562_s1 = smov 8  }
  0x1a   :  { %43 = dma.hbm_to_vmem [thread:$0]  %s646_s2, 1024, %s38_s24, [#allocation5], %s561_s0, %s561_s0, %s562_s1  }
  0x1b   :  { %s563_s28 = smov [#allocation11]  }
  0x1c   :  { %s49_s29 = sshll.u32 %s563_s28, 4  ;;  %s50_s29 = int_to_ptr.vmem [resolvable:$true] %s49_s29 }
  0x1d   :  { %s528_s30 = scalar_lea.vmem %s50_s29, 1024  ;;  %p533_p11 = scmp.lt.s32.totalorder %s50_s29, %s50_s29 }
  0x1e   :  { %p529_p10 = scmp.ne.s32.totalorder %s50_s29, %s528_s30  ;;  %p534_p12 = scmp.lt.s32.totalorder %s528_s30, %s528_s30 }
  0x20   :  { %p535_p13 = por %p534_p12, %p533_p11 }
  0x22   :  { %p536_p0 = pnand %p535_p13, %p529_p10 }
  0x24   :  { %539 = shalt.err (!%p536_p0)
}
  0x25   :  { %55 = dma.hbm_to_vmem [thread:$0]  %s647_s3, 1024, %s50_s29, [#allocation12], %s561_s0, %s561_s0, %s562_s1  }
  0x26   :  { %548 = dma.done.wait [#allocation6], 16  }
  0x27   :  { %549 = vsyncadd [#allocation6], 4294967280 }
  0x28   :  { %550 = dma.done.wait [#allocation8], 16  }
  0x29   :  { %551 = vsyncadd [#allocation8], 4294967280 }
  0x2a   :  { %552 = dma.done.wait [#allocation5], 1024  }
  0x2b   :  { %553 = vsyncadd [#allocation5], 4294966272 }
  0x2c   :  { %554 = dma.done.wait [#allocation12], 1024  }
  0x2d   :  { %555 = vsyncadd [#allocation12], 4294966272 }
  0x2e   :  { %68 = sfence }
  0x2f   :  { %s443_s2 = sld [smem:[#allocation4 + $0x10]]  ;;  %vm331_vm0 = vcmask 7168  }
  0x30   :  { %s444_s7 = sld [smem:[#allocation9 + $0x10]] }
  0x31   :  { %s445_s8 = sld [smem:[#allocation4 + $0x11]] }
  0x32   :  { %s446_s9 = sld [smem:[#allocation9 + $0x11]] }
  0x33   :  { %s447_s10 = sld [smem:[#allocation4 + $0x12]] }
  0x34   :  { %s448_s11 = sld [smem:[#allocation9 + $0x12]] }
  0x35   :  { %s449_s12 = sld [smem:[#allocation4 + $0x13]]  ;;  %s199_s13 = scalar_lea.vmem [#allocation10], %s443_s2 }
  0x36   :  { %v200_v0 = vld [vmem:[%s199_s13] sm:$0x1]  ;;  %s450_s14 = sld [smem:[#allocation9 + $0x13]]  ;;  %s202_s3 = scalar_lea.vmem [#allocation11], %s444_s7 }
  0x37   :  { %201 = vst [vmem:[#allocation2 + $0x10] sm:$0x1] %v200_v0  ;;  %v203_v1 = vld [vmem:[%s202_s3] sm:$0x1]  ;;  %s451_s15 = sld [smem:[#allocation4 + $0x14]]  ;;  %s207_s16 = scalar_lea.vmem [#allocation10], %s445_s8 }
  0x38   :  { %204 = vst [vmem:[#allocation3 + $0x10] sm:$0x1] %v203_v1  ;;  %v208_v2 = vld [vmem:[%s207_s16] sm:$0x1]  ;;  %s452_s17 = sld [smem:[#allocation9 + $0x14]]  ;;  %s210_s18 = scalar_lea.vmem [#allocation11], %s446_s9 }
  0x39   :  { %209 = vst [vmem:[#allocation2 + $0x11] sm:$0x1] %v208_v2  ;;  %v211_v3 = vld [vmem:[%s210_s18] sm:$0x1]  ;;  %s453_s19 = sld [smem:[#allocation4 + $0x15]]  ;;  %s215_s20 = scalar_lea.vmem [#allocation10], %s447_s10 }
  0x3a   :  { %212 = vst [vmem:[#allocation3 + $0x11] sm:$0x1] %v211_v3  ;;  %v216_v4 = vld [vmem:[%s215_s20] sm:$0x1]  ;;  %s454_s21 = sld [smem:[#allocation9 + $0x15]]  ;;  %s218_s22 = scalar_lea.vmem [#allocation11], %s448_s11 }
  0x3b   :  { %217 = vst [vmem:[#allocation2 + $0x12] sm:$0x1] %v216_v4  ;;  %v219_v5 = vld [vmem:[%s218_s22] sm:$0x1]  ;;  %s455_s23 = sld [smem:[#allocation4 + $0x16]]  ;;  %s223_s24 = scalar_lea.vmem [#allocation10], %s449_s12 }
  0x3c   :  { %220 = vst [vmem:[#allocation3 + $0x12] sm:$0x1] %v219_v5  ;;  %v224_v6 = vld [vmem:[%s223_s24] sm:$0x1]  ;;  %s456_s25 = sld [smem:[#allocation9 + $0x16]]  ;;  %s226_s0 = scalar_lea.vmem [#allocation11], %s450_s14 }
  0x3d   :  { %225 = vst [vmem:[#allocation2 + $0x13] sm:$0x1] %v224_v6  ;;  %v227_v7 = vld [vmem:[%s226_s0] sm:$0x1]  ;;  %s457_s1 = sld [smem:[#allocation4 + $0x17]]  ;;  %s231_s26 = scalar_lea.vmem [#allocation10], %s451_s15 }
  0x3e   :  { %228 = vst [vmem:[#allocation3 + $0x13] sm:$0x1] %v227_v7  ;;  %v232_v8 = vld [vmem:[%s231_s26] sm:$0x1]  ;;  %s458_s27 = sld [smem:[#allocation9 + $0x17]]  ;;  %s234_s28 = scalar_lea.vmem [#allocation11], %s452_s17 }
  0x3f   :  { %233 = vst [vmem:[#allocation2 + $0x14] sm:$0x1] %v232_v8  ;;  %v235_v9 = vld [vmem:[%s234_s28] sm:$0x1]  ;;  %s69_s29 = sld [smem:[#allocation4]]  ;;  %s239_s30 = scalar_lea.vmem [#allocation10], %s453_s19 }
  0x40   :  { %236 = vst [vmem:[#allocation3 + $0x14] sm:$0x1] %v235_v9  ;;  %v240_v10 = vld [vmem:[%s239_s30] sm:$0x1]  ;;  %s70_s5 = sld [smem:[#allocation9]]  ;;  %s242_s6 = scalar_lea.vmem [#allocation11], %s454_s21 }
  0x41   :  { %241 = vst [vmem:[#allocation2 + $0x15] sm:$0x1] %v240_v10  ;;  %v243_v11 = vld [vmem:[%s242_s6] sm:$0x1]  ;;  %s413_s2 = sld [smem:[#allocation4 + $0x1]]  ;;  %s247_s7 = scalar_lea.vmem [#allocation10], %s455_s23 }
  0x42   :  { %244 = vst [vmem:[#allocation3 + $0x15] sm:$0x1] %v243_v11  ;;  %v248_v12 = vld [vmem:[%s247_s7] sm:$0x1]  ;;  %s414_s8 = sld [smem:[#allocation9 + $0x1]]  ;;  %s250_s9 = scalar_lea.vmem [#allocation11], %s456_s25 }
  0x43   :  { %249 = vst [vmem:[#allocation2 + $0x16] sm:$0x1] %v248_v12  ;;  %v251_v13 = vld [vmem:[%s250_s9] sm:$0x1]  ;;  %s415_s10 = sld [smem:[#allocation4 + $0x2]]  ;;  %s255_s11 = scalar_lea.vmem [#allocation10], %s457_s1 }
  0x44   :  { %252 = vst [vmem:[#allocation3 + $0x16] sm:$0x1] %v251_v13  ;;  %v256_v14 = vld [vmem:[%s255_s11] sm:$0x1]  ;;  %s416_s12 = sld [smem:[#allocation9 + $0x2]]  ;;  %s258_s13 = scalar_lea.vmem [#allocation11], %s458_s27 }
  0x45   :  { %257 = vst [vmem:[#allocation2 + $0x17] sm:$0x1] %v256_v14  ;;  %v259_v15 = vld [vmem:[%s258_s13] sm:$0x1]  ;;  %s417_s14 = sld [smem:[#allocation4 + $0x3]]  ;;  %s71_s3 = scalar_lea.vmem [#allocation10], %s69_s29 }
  0x46   :  { %260 = vst [vmem:[#allocation3 + $0x17] sm:$0x1] %v259_v15  ;;  %v72_v16 = vld [vmem:[%s71_s3] sm:$0x1]  ;;  %s602_s15 = sld [smem:[#allocation9 + $0x3]]  ;;  %s74_s16 = scalar_lea.vmem [#allocation11], %s70_s5 }
  0x47   :  { %73 = vst [vmem:[#allocation2] sm:$0x1] %v72_v16  ;;  %v75_v17 = vld [vmem:[%s74_s16] sm:$0x1]  ;;  %s604_s17 = sld [smem:[#allocation4 + $0x4]]  ;;  %s79_s18 = scalar_lea.vmem [#allocation10], %s413_s2 }
  0x48   :  { %76 = vst [vmem:[#allocation3] sm:$0x1] %v75_v17  ;;  %v80_v18 = vld [vmem:[%s79_s18] sm:$0x1]  ;;  %s606_s19 = sld [smem:[#allocation9 + $0x4]]  ;;  %s82_s20 = scalar_lea.vmem [#allocation11], %s414_s8 }
  0x49   :  { %81 = vst [vmem:[#allocation2 + $0x1] sm:$0x1] %v80_v18  ;;  %v83_v19 = vld [vmem:[%s82_s20] sm:$0x1]  ;;  %s608_s21 = sld [smem:[#allocation4 + $0x5]]  ;;  %s87_s22 = scalar_lea.vmem [#allocation10], %s415_s10 }
  0x4a   :  { %84 = vst [vmem:[#allocation3 + $0x1] sm:$0x1] %v83_v19  ;;  %v88_v20 = vld [vmem:[%s87_s22] sm:$0x1]  ;;  %s610_s23 = sld [smem:[#allocation9 + $0x5]]  ;;  %s90_s24 = scalar_lea.vmem [#allocation11], %s416_s12 }
  0x4b   :  { %89 = vst [vmem:[#allocation2 + $0x2] sm:$0x1] %v88_v20  ;;  %v91_v21 = vld [vmem:[%s90_s24] sm:$0x1]  ;;  %s612_s25 = sld [smem:[#allocation4 + $0x6]]  ;;  %s95_s0 = scalar_lea.vmem [#allocation10], %s417_s14 }
  0x4c   :  { %v263_v22 = vld [vmem:[#allocation2 + $0x10] sm:$0xff]  ;;  %92 = vst [vmem:[#allocation3 + $0x2] sm:$0x1] %v91_v21  ;;  %v96_v23 = vld [vmem:[%s95_s0] sm:$0x1]  ;;  %s614_s1 = sld [smem:[#allocation9 + $0x6]] }
  0x4d   :  { %v266_v24 = vld [vmem:[#allocation3 + $0x10] sm:$0xff]  ;;  %97 = vst [vmem:[#allocation2 + $0x3] sm:$0x1] %v96_v23  ;;  %s98_s26 = scalar_lea.vmem [#allocation11], %s602_s15  ;;  %s617_s27 = sld [smem:[#allocation4 + $0x7]] }
  0x4e   :  { %v99_v25 = vld [vmem:[%s98_s26] sm:$0x1]  ;;  %v269_v26 = vmul.f32 %v266_v24, %v263_v22  ;;  %s103_s28 = scalar_lea.vmem [#allocation10], %s604_s17  ;;  %s426_s29 = sld [smem:[#allocation9 + $0x7]] }
  0x4f   :  { %100 = vst [vmem:[#allocation3 + $0x3] sm:$0x1] %v99_v25  ;;  %v104_v27 = vld [vmem:[%s103_s28] sm:$0x1]  ;;  %s106_s30 = scalar_lea.vmem [#allocation11], %s606_s19  ;;  %s427_s5 = sld [smem:[#allocation4 + $0x8]] }
  0x50   :  { %105 = vst [vmem:[#allocation2 + $0x4] sm:$0x1] %v104_v27  ;;  %v107_v28 = vld [vmem:[%s106_s30] sm:$0x1]  ;;  %274 = vadd.xlane.f32.xlu1 %v269_v26  ;;  %s111_s6 = scalar_lea.vmem [#allocation10], %s608_s21  ;;  %s428_s2 = sld [smem:[#allocation9 + $0x8]] }
  0x51   :  { %108 = vst [vmem:[#allocation3 + $0x4] sm:$0x1] %v107_v28  ;;  %v112_v29 = vld [vmem:[%s111_s6] sm:$0x1]  ;;  %s114_s7 = scalar_lea.vmem [#allocation11], %s610_s23  ;;  %s429_s8 = sld [smem:[#allocation4 + $0x9]] }
  0x52   :  { %113 = vst [vmem:[#allocation2 + $0x5] sm:$0x1] %v112_v29  ;;  %v115_v30 = vld [vmem:[%s114_s7] sm:$0x1]  ;;  %s119_s9 = scalar_lea.vmem [#allocation10], %s612_s25  ;;  %s430_s10 = sld [smem:[#allocation9 + $0x9]] }
  0x53   :  { %116 = vst [vmem:[#allocation3 + $0x5] sm:$0x1] %v115_v30  ;;  %v120_v31 = vld [vmem:[%s119_s9] sm:$0x1]  ;;  %s122_s11 = scalar_lea.vmem [#allocation11], %s614_s1  ;;  %s431_s12 = sld [smem:[#allocation4 + $0xa]] }
  0x54   :  { %121 = vst [vmem:[#allocation2 + $0x6] sm:$0x1] %v120_v31  ;;  %v123_v32 = vld [vmem:[%s122_s11] sm:$0x1]  ;;  %s127_s13 = scalar_lea.vmem [#allocation10], %s617_s27  ;;  %s432_s14 = sld [smem:[#allocation9 + $0xa]] }
  0x55   :  { %124 = vst [vmem:[#allocation3 + $0x6] sm:$0x1] %v123_v32  ;;  %v128_v33 = vld [vmem:[%s127_s13] sm:$0x1]  ;;  %s130_s3 = scalar_lea.vmem [#allocation11], %s426_s29  ;;  %s433_s15 = sld [smem:[#allocation4 + $0xb]] }
  0x56   :  { %129 = vst [vmem:[#allocation2 + $0x7] sm:$0x1] %v128_v33  ;;  %v131_v34 = vld [vmem:[%s130_s3] sm:$0x1]  ;;  %s135_s16 = scalar_lea.vmem [#allocation10], %s427_s5  ;;  %s626_s17 = sld [smem:[#allocation9 + $0xb]] }
  0x57   :  { %132 = vst [vmem:[#allocation3 + $0x7] sm:$0x1] %v131_v34  ;;  %v136_v35 = vld [vmem:[%s135_s16] sm:$0x1]  ;;  %s138_s18 = scalar_lea.vmem [#allocation11], %s428_s2  ;;  %s628_s19 = sld [smem:[#allocation4 + $0xc]] }
  0x58   :  { %137 = vst [vmem:[#allocation2 + $0x8] sm:$0x1] %v136_v35  ;;  %v139_v36 = vld [vmem:[%s138_s18] sm:$0x1]  ;;  %s143_s20 = scalar_lea.vmem [#allocation10], %s429_s8  ;;  %s630_s21 = sld [smem:[#allocation9 + $0xc]] }
  0x59   :  { %140 = vst [vmem:[#allocation3 + $0x8] sm:$0x1] %v139_v36  ;;  %v144_v37 = vld [vmem:[%s143_s20] sm:$0x1]  ;;  %s146_s22 = scalar_lea.vmem [#allocation11], %s430_s10  ;;  %s632_s23 = sld [smem:[#allocation4 + $0xd]] }
  0x5a   :  { %145 = vst [vmem:[#allocation2 + $0x9] sm:$0x1] %v144_v37  ;;  %v147_v38 = vld [vmem:[%s146_s22] sm:$0x1]  ;;  %s151_s24 = scalar_lea.vmem [#allocation10], %s431_s12  ;;  %s634_s25 = sld [smem:[#allocation9 + $0xd]] }
  0x5b   :  { %148 = vst [vmem:[#allocation3 + $0x9] sm:$0x1] %v147_v38  ;;  %v152_v39 = vld [vmem:[%s151_s24] sm:$0x1]  ;;  %s154_s0 = scalar_lea.vmem [#allocation11], %s432_s14  ;;  %s439_s1 = sld [smem:[#allocation4 + $0xe]] }
  0x5c   :  { %153 = vst [vmem:[#allocation2 + $0xa] sm:$0x1] %v152_v39  ;;  %v155_v40 = vld [vmem:[%s154_s0] sm:$0x1]  ;;  %s159_s26 = scalar_lea.vmem [#allocation10], %s433_s15  ;;  %s440_s27 = sld [smem:[#allocation9 + $0xe]] }
  0x5d   :  { %v261_v41 = vld [vmem:[#allocation2] sm:$0xff]  ;;  %156 = vst [vmem:[#allocation3 + $0xa] sm:$0x1] %v155_v40  ;;  %s162_s28 = scalar_lea.vmem [#allocation11], %s626_s17  ;;  %s441_s29 = sld [smem:[#allocation4 + $0xf]] }
  0x5e   :  { %v160_v42 = vld [vmem:[%s159_s26] sm:$0x1]  ;;  %v264_v43 = vld [vmem:[#allocation3] sm:$0xff]  ;;  %s167_s30 = scalar_lea.vmem [#allocation10], %s628_s19  ;;  %s442_s5 = sld [smem:[#allocation9 + $0xf]] }
  0x5f   :  { %161 = vst [vmem:[#allocation2 + $0xb] sm:$0x1] %v160_v42  ;;  %v163_v44 = vld [vmem:[%s162_s28] sm:$0x1]  ;;  %v267_v45 = vmul.f32 %v264_v43, %v261_v41  ;;  %s170_s6 = scalar_lea.vmem [#allocation11], %s630_s21  ;;  %s175_s2 = scalar_lea.vmem [#allocation10], %s632_s23 }
  0x60   :  { %164 = vst [vmem:[#allocation3 + $0xb] sm:$0x1] %v163_v44  ;;  %v168_v46 = vld [vmem:[%s167_s30] sm:$0x1]  ;;  %s178_s7 = scalar_lea.vmem [#allocation11], %s634_s25  ;;  %s564_s13 = smov [#allocation13]  }
  0x61   :  { %169 = vst [vmem:[#allocation2 + $0xc] sm:$0x1] %v168_v46  ;;  %v171_v47 = vld [vmem:[%s170_s6] sm:$0x1]  ;;  %270 = vadd.xlane.f32.xlu0 %v267_v45  ;;  %s183_s8 = scalar_lea.vmem [#allocation10], %s439_s1 }
  0x62   :  { %172 = vst [vmem:[#allocation3 + $0xc] sm:$0x1] %v171_v47  ;;  %v176_v48 = vld [vmem:[%s175_s2] sm:$0x1]  ;;  %s186_s9 = scalar_lea.vmem [#allocation11], %s440_s27 }
  0x63   :  { %177 = vst [vmem:[#allocation2 + $0xd] sm:$0x1] %v176_v48  ;;  %v179_v49 = vld [vmem:[%s178_s7] sm:$0x1]  ;;  %s191_s10 = scalar_lea.vmem [#allocation10], %s441_s29 }
  0x64   :  { %180 = vst [vmem:[#allocation3 + $0xd] sm:$0x1] %v179_v49  ;;  %v184_v50 = vld [vmem:[%s183_s8] sm:$0x1]  ;;  %s194_s11 = scalar_lea.vmem [#allocation11], %s442_s5 }
  0x65   :  { %185 = vst [vmem:[#allocation2 + $0xe] sm:$0x1] %v184_v50  ;;  %v187_v51 = vld [vmem:[%s186_s9] sm:$0x1] }
  0x66   :  { %188 = vst [vmem:[#allocation3 + $0xe] sm:$0x1] %v187_v51  ;;  %v192_v52 = vld [vmem:[%s191_s10] sm:$0x1] }
  0x67   :  { %193 = vst [vmem:[#allocation2 + $0xf] sm:$0x1] %v192_v52  ;;  %v195_v53 = vld [vmem:[%s194_s11] sm:$0x1] }
  0x68   :  { %196 = vst [vmem:[#allocation3 + $0xf] sm:$0x1] %v195_v53 }
  0x6e   :  { %v262_v54 = vld [vmem:[#allocation2 + $0x8] sm:$0xff] }
  0x6f   :  { %v265_v55 = vld [vmem:[#allocation3 + $0x8] sm:$0xff] }
  0x70   :  { %v268_v56 = vmul.f32 %v265_v55, %v262_v54 }
  0x72   :  { %272 = vadd.xlane.f32.xlu0 %v268_v56 }
  0xd9   :  { %v275_v57 = vpop.xlane.xlu1 %274 }
  0xda   :  { %v300_v59 = vand.u32 2147483647, %v275_v57  ;;  %v297_v17 = vmax.f32 %v275_v57, 0.0 }
  0xdc   :  { %v303_v62 = vsub.f32 0.0, %v300_v59 }
  0xde   :  { %v308_v1 = vmul.f32 1.442695, %v303_v62 }
  0xea   :  { %v271_v58 = vpop.xlane.xlu0 %270 }
  0xeb   :  { %v286_v60 = vsub.f32 0.0, %v271_v58 }
  0xed   :  { %v298_v61 = vand.u32 2147483647, %v286_v60  ;;  %v295_v16 = vmax.f32 %v286_v60, 0.0 }
  0xef   :  { %v301_v63 = vsub.f32 0.0, %v298_v61 }
  0xf1   :  { %v304_v0 = vmul.f32 1.442695, %v301_v63 }
  0xf3   :  { %468 = vpow2.f32 %v304_v0 }
  0xf4   :  { %470 = vpow2.f32 %v308_v1 }
  0xfb   :  { %v273_v2 = vpop.xlane.xlu0 %272 }
  0xfc   :  { %v299_v3 = vand.u32 2147483647, %v273_v2  ;;  %v296_v21 = vmax.f32 %v273_v2, 0.0 }
  0xfe   :  { %v302_v4 = vsub.f32 0.0, %v299_v3 }
 0x100   :  { %v306_v5 = vmul.f32 1.442695, %v302_v4  ;;  %v469_v6 = vpop.eup %468 }
 0x101   :  { %v471_v7 = vpop.eup %470  ;;  %v310_v8 = vadd.f32 1.0, %v469_v6 }
 0x102   :  { %472 = vpow2.f32 %v306_v5  ;;  %v312_v9 = vadd.f32 1.0, %v471_v7 }
 0x103   :  { %474 = vlog2.f32 %v310_v8 }
 0x104   :  { %476 = vlog2.f32 %v312_v9 }
 0x10f   :  { %v473_v10 = vpop.eup %472 }
 0x110   :  { %v311_v11 = vadd.f32 1.0, %v473_v10  ;;  %v475_v12 = vpop.eup %474 }
 0x111   :  { %v477_v13 = vpop.eup %476  ;;  %v314_v14 = vmul.f32 0.6931472, %v475_v12 }
 0x112   :  { %478 = vlog2.f32 %v311_v11  ;;  %v318_v15 = vmul.f32 0.6931472, %v477_v13 }
 0x113   :  { %v319_v18 = vadd.f32 %v314_v14, %v295_v16 }
 0x114   :  { %v321_v20 = vadd.f32 %v318_v15, %v297_v17 }
 0x115   :  { %v328_v23 = vmul.f32 0.125, %v319_v18 }
 0x116   :  { %v330_v25 = vmul.f32 0.0625, %v321_v20 }
 0x117   :  { %v332_v27 = vsel %vm331_vm0, %v328_v23, 0.0 }
 0x118   :  { %v335_v30 = vsel %vm331_vm0, %v330_v25, 0.0 }
 0x11f   :  { %v479_v19 = vpop.eup %478 }
 0x120   :  { %v316_v22 = vmul.f32 0.6931472, %v479_v19 }
 0x122   :  { %v320_v24 = vadd.f32 %v316_v22, %v296_v21 }
 0x124   :  { %v329_v26 = vmul.f32 0.0625, %v320_v24 }
 0x126   :  { %v333_v28 = vsel %vm331_vm0, %v329_v26, 0.0 }
 0x127   :  { %v334_v29 = vadd.f32 %v333_v28, %v332_v27 }
 0x129   :  { %v336_v31 = vadd.f32 %v335_v30, %v334_v29 }
 0x12b   :  { %337 = vadd.xlane.f32.xlu1 %v336_v31 }
 0x1b4   :  { %v338_v32 = vpop.xlane.xlu1 %337 }
 0x1b5   :  { %v339_v33 = vrot.slane %v338_v32, 4 }
 0x1b7   :  { %v340_v34 = vadd.f32 %v339_v33, %v338_v32 }
 0x1b9   :  { %v341_v35 = vrot.slane %v340_v34, 2 }
 0x1bb   :  { %v342_v36 = vadd.f32 %v341_v35, %v340_v34 }
 0x1bd   :  { %v343_v37 = vrot.slane %v342_v36, 1 }
 0x1bf   :  { %v344_v38 = vadd.f32 %v343_v37, %v342_v36 }
 0x1c1   :  { %459 = vpush %v344_v38 }
 0x1f2   :  { %s460_s12 = spop %459 }
 0x1f3   :  { %347 = sst [smem:[#allocation13]] %s460_s12 }
 0x1f4   :  { %355 = dma.smem_to_hbm %s564_s13, 16, %s648_s4, [#allocation7]  }
 0x1f5   :  { %556 = dma.done.wait [#allocation7], 16  }
 0x1f6   :  { %557 = vsyncadd [#allocation7], 4294967280 }
 0x1f7   :  { %359 = sfence }
 0x1f8   :  { %360 = vsyncpa [#allocation5], 1 }
 0x1f9   :  { %361 = vsyncpa [#allocation12], 1 }
 0x1fa   :  { %362 = vsyncpa [#allocation6], 1 }
 0x1fb   :  { %363 = vsyncpa [#allocation7], 1 }
 0x1fc   :  { %364 = vsyncpa [#allocation8], 1 }

</bundles_post_ra>
